<compile_context>
chip_gen: v5e
topology: v5e:2x2
jax: 0.10.0
libtpu: 0.0.40
codegen_flags: <defaults>
</compile_context>

<pallas_src>
import functools
import math

import jax
import jax.numpy as jnp
from jax.experimental import pallas as pl
from jax.experimental.pallas import tpu as pltpu


# ----------------------------- Pallas kernel -----------------------------

def _encoder_layer_kernel(*refs, n_heads, S, E, has_bias):
    """One grid step = one (batch element, layer) pair of the encoder stack."""
    if has_bias:
        (x_ref, bias_ref, wq_ref, wk_ref, wv_ref, bq_ref, bk_ref, bv_ref,
         wo_ref, bo_ref, ln1_g_ref, ln1_b_ref, w1_ref, b1_ref, w2_ref, b2_ref,
         ln2_g_ref, ln2_b_ref, o_ref, acc_ref) = refs
    else:
        bias_ref = None
        (x_ref, wq_ref, wk_ref, wv_ref, bq_ref, bk_ref, bv_ref,
         wo_ref, bo_ref, ln1_g_ref, ln1_b_ref, w1_ref, b1_ref, w2_ref, b2_ref,
         ln2_g_ref, ln2_b_ref, o_ref, acc_ref) = refs

    depth = E // n_heads
    l = pl.program_id(1)
    n_layers = pl.num_programs(1)

    # Load this batch element's activations into the resident accumulator once.
    @pl.when(l == 0)
    def _():
        acc_ref[...] = x_ref[0]

    x = acc_ref[...]                                    # (S, E) f32

    def layer_norm(z, g, b):
        mu = jnp.mean(z, axis=-1, keepdims=True)
        var = jnp.mean(jnp.square(z - mu), axis=-1, keepdims=True)
        return (z - mu) * jax.lax.rsqrt(var + 1e-5) * g + b   # PyTorch LayerNorm eps

    # ---------------- multi-head self-attention (scale folded into Wq) ----------------
    x_bf = x.astype(jnp.bfloat16)
    q = (jnp.dot(x_bf, wq_ref[0], preferred_element_type=jnp.float32)
         + bq_ref[0]).astype(jnp.bfloat16)              # (S, E)
    k = (jnp.dot(x_bf, wk_ref[0], preferred_element_type=jnp.float32)
         + bk_ref[0]).astype(jnp.bfloat16)
    v = (jnp.dot(x_bf, wv_ref[0], preferred_element_type=jnp.float32)
         + bv_ref[0]).astype(jnp.bfloat16)

    if n_heads == 1:
        logits = jnp.einsum("qd,kd->qk", q, k,
                            preferred_element_type=jnp.float32)       # (S, S)
        if has_bias:
            logits = logits + bias_ref[0]
        m = jnp.max(logits, axis=-1, keepdims=True)
        e = jnp.exp(logits - m)
        p = e * pl.reciprocal(jnp.sum(e, axis=-1, keepdims=True), approx=True)
        attn = jnp.dot(p.astype(jnp.bfloat16), v,
                       preferred_element_type=jnp.float32)            # (S, E)
    else:
        qh = q.reshape(S, n_heads, depth)
        kh = k.reshape(S, n_heads, depth)
        vh = v.reshape(S, n_heads, depth)
        logits = jnp.einsum("qhd,khd->hqk", qh, kh,
                            preferred_element_type=jnp.float32)       # (H, S, S)
        if has_bias:
            logits = logits + bias_ref[0][None, :, :]
        m = jnp.max(logits, axis=-1, keepdims=True)
        e = jnp.exp(logits - m)
        p = e * pl.reciprocal(jnp.sum(e, axis=-1, keepdims=True), approx=True)
        attn = jnp.einsum("hqk,khd->qhd", p.astype(jnp.bfloat16), vh,
                          preferred_element_type=jnp.float32).reshape(S, E)

    proj = jnp.dot(attn.astype(jnp.bfloat16), wo_ref[0],
                   preferred_element_type=jnp.float32) + bo_ref[0]
    x = layer_norm(x + proj, ln1_g_ref[0], ln1_b_ref[0])              # post-norm

    # ---------------- position-wise feed-forward (ReLU) ----------------
    h1 = jnp.dot(x.astype(jnp.bfloat16), w1_ref[0],
                 preferred_element_type=jnp.float32) + b1_ref[0]
    h1 = jnp.maximum(h1, 0.0)
    h2 = jnp.dot(h1.astype(jnp.bfloat16), w2_ref[0],
                 preferred_element_type=jnp.float32) + b2_ref[0]
    x = layer_norm(x + h2, ln2_g_ref[0], ln2_b_ref[0])

    acc_ref[...] = x

    @pl.when(l == n_layers - 1)
    def _():
        o_ref[0] = x


# ----------------------------- wrapper -----------------------------

def stacked_transformer_fwd(params, src, src_mask=None, src_key_padding_mask=None):
    """src: (B, S, E) float. Mirrors StackedTransformer.forward (batch-first in/out)."""
    B, S, E = src.shape
    L = params["n_layers"]
    H = params["n_heads"]

    has_bias = (src_mask is not None) or (src_key_padding_mask is not None)

    inputs = [src.astype(jnp.float32)]
    in_specs = [pl.BlockSpec((1, S, E), lambda b, l: (b, 0, 0))]

    if has_bias:
        # Fold both masks into one additive (B, S, S) f32 bias (only when masking is requested).
        bias = jnp.zeros((B, S, S), jnp.float32)
        if src_mask is not None:
            m = src_mask
            if m.dtype == jnp.bool_:
                m = jnp.where(m, -1e9, 0.0)
            bias = bias + m.astype(jnp.float32)[None, :, :]
        if src_key_padding_mask is not None:
            kp = jnp.where(src_key_padding_mask.astype(jnp.bool_), -1e9, 0.0)
            bias = bias + kp[:, None, :].astype(jnp.float32)
        inputs.append(bias)
        in_specs.append(pl.BlockSpec((1, S, S), lambda b, l: (b, 0, 0)))

    # Per-layer weights: block out one layer at a time (double-buffered by the pipeline).
    def wspec(arr):
        _, r, c = arr.shape
        return pl.BlockSpec((1, r, c), lambda b, l: (l, 0, 0))

    weight_names = ("wq", "wk", "wv", "bq", "bk", "bv", "wo", "bo",
                    "ln1_g", "ln1_b", "w1", "b1", "w2", "b2", "ln2_g", "ln2_b")
    for name in weight_names:
        inputs.append(params[name])
        in_specs.append(wspec(params[name]))

    kern = functools.partial(_encoder_layer_kernel,
                             n_heads=H, S=S, E=E, has_bias=has_bias)

    out = pl.pallas_call(
        kern,
        out_shape=jax.ShapeDtypeStruct((B, S, E), jnp.float32),
        grid_spec=pltpu.PrefetchScalarGridSpec(
            num_scalar_prefetch=0,
            grid=(B, L),
            in_specs=in_specs,
            out_specs=pl.BlockSpec((1, S, E), lambda b, l: (b, 0, 0)),
            scratch_shapes=[pltpu.VMEM((S, E), jnp.float32)]),
        compiler_params=pltpu.CompilerParams(
            dimension_semantics=("parallel", "arbitrary"),
            vmem_limit_bytes=32 * 1024 * 1024),
    )(*inputs)
    return out


# ----------------------------- pure-JAX reference (f32) -----------------------------

def _reference_forward(params, src):
    B, S, E = src.shape
    H = params["n_heads"]
    L = params["n_layers"]
    d = E // H
    f32 = lambda a: a.astype(jnp.float32)

    def ln(z, g, b):
        mu = z.mean(-1, keepdims=True)
        var = ((z - mu) ** 2).mean(-1, keepdims=True)
        return (z - mu) / jnp.sqrt(var + 1e-5) * g + b

    x = src.astype(jnp.float32)
    for l in range(L):
        q = x @ f32(params["wq"][l]) + params["bq"][l]
        k = x @ f32(params["wk"][l]) + params["bk"][l]
        v = x @ f32(params["wv"][l]) + params["bv"][l]
        qh = q.reshape(B, S, H, d)
        kh = k.reshape(B, S, H, d)
        vh = v.reshape(B, S, H, d)
        logits = jnp.einsum("bqhd,bkhd->bhqk", qh, kh)
        p = jax.nn.softmax(logits, axis=-1)
        attn = jnp.einsum("bhqk,bkhd->bqhd", p, vh).reshape(B, S, E)
        proj = attn @ f32(params["wo"][l]) + params["bo"][l]
        x = ln(x + proj, params["ln1_g"][l], params["ln1_b"][l])
        h1 = jnp.maximum(x @ f32(params["w1"][l]) + params["b1"][l], 0.0)
        h2 = h1 @ f32(params["w2"][l]) + params["b2"][l]
        x = ln(x + h2, params["ln2_g"][l], params["ln2_b"][l])
    return x


# ----------------------------- deterministic init -----------------------------

def init_stacked_transformer(key, embedding_size=64, n_heads=1, hidden_size=64,
                             n_layers=6):
    E, dff, L = embedding_size, hidden_size, n_layers
    depth = E // n_heads
    scale = 1.0 / math.sqrt(depth)
    keys = jax.random.split(key, 8 * L)

    def uni(k, lim, shape):
        return jax.random.uniform(k, shape, jnp.float32, -lim, lim)

    lim_in = math.sqrt(6.0 / (E + 3 * E))   # xavier_uniform over torch's (3E, E) in_proj
    lim_e = 1.0 / math.sqrt(E)              # torch Linear default (fan_in = E)
    lim_f = 1.0 / math.sqrt(dff)            # torch Linear default (fan_in = dff)

    acc = {n: [] for n in ("wq", "wk", "wv", "wo", "w1", "b1", "w2", "b2")}
    for l in range(L):
        kq, kk, kv, ko, k1, kb1, k2, kb2 = keys[8 * l:8 * l + 8]
        acc["wq"].append(uni(kq, lim_in, (E, E)) * scale)   # 1/sqrt(depth) folded in
        acc["wk"].append(uni(kk, lim_in, (E, E)))
        acc["wv"].append(uni(kv, lim_in, (E, E)))
        acc["wo"].append(uni(ko, lim_e, (E, E)))
        acc["w1"].append(uni(k1, lim_e, (E, dff)))
        acc["b1"].append(uni(kb1, lim_e, (1, dff)))
        acc["w2"].append(uni(k2, lim_f, (dff, E)))
        acc["b2"].append(uni(kb2, lim_f, (1, E)))

    zeros_e = jnp.zeros((L, 1, E), jnp.float32)
    ones_e = jnp.ones((L, 1, E), jnp.float32)

    return dict(
        n_layers=L, n_heads=n_heads,
        wq=jnp.stack(acc["wq"]).astype(jnp.bfloat16),
        wk=jnp.stack(acc["wk"]).astype(jnp.bfloat16),
        wv=jnp.stack(acc["wv"]).astype(jnp.bfloat16),
        bq=zeros_e, bk=zeros_e, bv=zeros_e,           # torch in_proj_bias init = 0
        wo=jnp.stack(acc["wo"]).astype(jnp.bfloat16),
        bo=zeros_e,                                   # torch zeroes out_proj bias
        w1=jnp.stack(acc["w1"]).astype(jnp.bfloat16),
        b1=jnp.stack(acc["b1"]),
        w2=jnp.stack(acc["w2"]).astype(jnp.bfloat16),
        b2=jnp.stack(acc["b2"]),
        ln1_g=ones_e, ln1_b=zeros_e, ln2_g=ones_e, ln2_b=zeros_e,
    )


# ----------------------------- main -----------------------------

if __name__ == "__main__":
    # Module defaults: embedding_size=64, n_heads=1, hidden_size=64, n_layers=6.
    embedding_size = 64
    n_heads = 1
    hidden_size = 64
    n_layers = 6
    B, S = 2, 8

    key = jax.random.PRNGKey(0)
    k_param, k_src = jax.random.split(key)

    params = init_stacked_transformer(k_param, embedding_size, n_heads,
                                      hidden_size, n_layers)
    src = jax.random.normal(k_src, (B, S, embedding_size), jnp.float32)

    out = stacked_transformer_fwd(params, src)        # src_mask / key_padding_mask = None
    out = jax.block_until_ready(out)

    assert out.shape == (B, S, embedding_size)
    assert bool(jnp.all(jnp.isfinite(out)))

    # Loose-tolerance numerical check vs. an f32 reference (bf16 MXU operands in-kernel).
    ref = _reference_forward(params, src)
    err = float(jnp.max(jnp.abs(out - ref)))
    assert err < 1e-1, f"max abs error vs reference too large: {err}"

    print("KERNEL_OK")
</pallas_src>

<mosaic_0001>
module attributes {stable_mosaic.version = 11 : i64} {
  func.func @_encoder_layer_kernel(%arg0: i32, %arg1: i32, %arg2: memref<1x8x64xf32, #tpu.memory_space<vmem>>, %arg3: memref<1x64x64xbf16, #tpu.memory_space<vmem>>, %arg4: memref<1x64x64xbf16, #tpu.memory_space<vmem>>, %arg5: memref<1x64x64xbf16, #tpu.memory_space<vmem>>, %arg6: memref<1x1x64xf32, #tpu.memory_space<vmem>>, %arg7: memref<1x1x64xf32, #tpu.memory_space<vmem>>, %arg8: memref<1x1x64xf32, #tpu.memory_space<vmem>>, %arg9: memref<1x64x64xbf16, #tpu.memory_space<vmem>>, %arg10: memref<1x1x64xf32, #tpu.memory_space<vmem>>, %arg11: memref<1x1x64xf32, #tpu.memory_space<vmem>>, %arg12: memref<1x1x64xf32, #tpu.memory_space<vmem>>, %arg13: memref<1x64x64xbf16, #tpu.memory_space<vmem>>, %arg14: memref<1x1x64xf32, #tpu.memory_space<vmem>>, %arg15: memref<1x64x64xbf16, #tpu.memory_space<vmem>>, %arg16: memref<1x1x64xf32, #tpu.memory_space<vmem>>, %arg17: memref<1x1x64xf32, #tpu.memory_space<vmem>>, %arg18: memref<1x1x64xf32, #tpu.memory_space<vmem>>, %arg19: memref<1x8x64xf32, #tpu.memory_space<vmem>>, %arg20: memref<8x64xf32, #tpu.memory_space<vmem>>) attributes {dimension_semantics = [#tpu.dimension_semantics<parallel>, #tpu.dimension_semantics<arbitrary>], iteration_bounds = array<i64: 2, 6>, scalar_prefetch = 0 : i64, scratch_operands = 1 : i64, tpu.core_type = #tpu.core_type<tc>, window_params = [{transform_indices = @transform_0, window_bounds = array<i64: 1, 8, 64>}, {transform_indices = @transform_1, window_bounds = array<i64: 1, 64, 64>}, {transform_indices = @transform_2, window_bounds = array<i64: 1, 64, 64>}, {transform_indices = @transform_3, window_bounds = array<i64: 1, 64, 64>}, {transform_indices = @transform_4, window_bounds = array<i64: 1, 1, 64>}, {transform_indices = @transform_5, window_bounds = array<i64: 1, 1, 64>}, {transform_indices = @transform_6, window_bounds = array<i64: 1, 1, 64>}, {transform_indices = @transform_7, window_bounds = array<i64: 1, 64, 64>}, {transform_indices = @transform_8, window_bounds = array<i64: 1, 1, 64>}, {transform_indices = @transform_9, window_bounds = array<i64: 1, 1, 64>}, {transform_indices = @transform_10, window_bounds = array<i64: 1, 1, 64>}, {transform_indices = @transform_11, window_bounds = array<i64: 1, 64, 64>}, {transform_indices = @transform_12, window_bounds = array<i64: 1, 1, 64>}, {transform_indices = @transform_13, window_bounds = array<i64: 1, 64, 64>}, {transform_indices = @transform_14, window_bounds = array<i64: 1, 1, 64>}, {transform_indices = @transform_15, window_bounds = array<i64: 1, 1, 64>}, {transform_indices = @transform_16, window_bounds = array<i64: 1, 1, 64>}, {transform_indices = @transform_17, window_bounds = array<i64: 1, 8, 64>}]} {
    %c0_i32 = arith.constant 0 : i32
    %0 = arith.cmpi eq, %arg1, %c0_i32 : i32
    %1 = arith.extui %0 : i1 to i32
    %c0_i32_0 = arith.constant 0 : i32
    %2 = arith.cmpi ne, %1, %c0_i32_0 : i32
    scf.if %2 {
      %c0_73 = arith.constant 0 : index
      %c0_74 = arith.constant 0 : index
      %c0_75 = arith.constant 0 : index
      %126 = vector.load %arg2[%c0_73, %c0_74, %c0_75] : memref<1x8x64xf32, #tpu.memory_space<vmem>>, vector<1x8x64xf32>
      %127 = vector.shape_cast %126 : vector<1x8x64xf32> to vector<8x64xf32>
      %c0_76 = arith.constant 0 : index
      %c0_77 = arith.constant 0 : index
      %128 = vector.load %arg20[%c0_76, %c0_77] : memref<8x64xf32, #tpu.memory_space<vmem>>, vector<8x64xf32>
      tpu.vector_store %arg20[%c0_76, %c0_77], %127 {strides = array<i32>} : memref<8x64xf32, #tpu.memory_space<vmem>>, vector<8x64xf32>,
    } else {
    }
    %c0 = arith.constant 0 : index
    %c0_1 = arith.constant 0 : index
    %3 = vector.load %arg20[%c0, %c0_1] : memref<8x64xf32, #tpu.memory_space<vmem>>, vector<8x64xf32>
    %4 = arith.truncf %3 : vector<8x64xf32> to vector<8x64xbf16>
    %c0_2 = arith.constant 0 : index
    %c0_3 = arith.constant 0 : index
    %c0_4 = arith.constant 0 : index
    %5 = vector.load %arg3[%c0_2, %c0_3, %c0_4] : memref<1x64x64xbf16, #tpu.memory_space<vmem>>, vector<1x64x64xbf16>
    %6 = vector.shape_cast %5 : vector<1x64x64xbf16> to vector<64x64xbf16>
    %cst = arith.constant dense<0.000000e+00> : vector<8x64xf32>
    %7 = tpu.matmul %4, %6, %cst {dimension_numbers = #tpu.dot_dimension_numbers<[1], [0], [0], [1], [0, 0, 1, 1], [], []>} : vector<8x64xbf16>, vector<64x64xbf16>, vector<8x64xf32> -> vector<8x64xf32>
    %c0_5 = arith.constant 0 : index
    %c0_6 = arith.constant 0 : index
    %c0_7 = arith.constant 0 : index
    %8 = vector.load %arg6[%c0_5, %c0_6, %c0_7] : memref<1x1x64xf32, #tpu.memory_space<vmem>>, vector<1x1x64xf32>
    %9 = vector.shape_cast %8 : vector<1x1x64xf32> to vector<1x64xf32>
    %10 = vector.broadcast %9 : vector<1x64xf32> to vector<8x64xf32>
    %11 = arith.addf %7, %10 : vector<8x64xf32>
    %12 = arith.truncf %11 : vector<8x64xf32> to vector<8x64xbf16>
    %c0_8 = arith.constant 0 : index
    %c0_9 = arith.constant 0 : index
    %c0_10 = arith.constant 0 : index
    %13 = vector.load %arg4[%c0_8, %c0_9, %c0_10] : memref<1x64x64xbf16, #tpu.memory_space<vmem>>, vector<1x64x64xbf16>
    %14 = vector.shape_cast %13 : vector<1x64x64xbf16> to vector<64x64xbf16>
    %cst_11 = arith.constant dense<0.000000e+00> : vector<8x64xf32>
    %15 = tpu.matmul %4, %14, %cst_11 {dimension_numbers = #tpu.dot_dimension_numbers<[1], [0], [0], [1], [0, 0, 1, 1], [], []>} : vector<8x64xbf16>, vector<64x64xbf16>, vector<8x64xf32> -> vector<8x64xf32>
    %c0_12 = arith.constant 0 : index
    %c0_13 = arith.constant 0 : index
    %c0_14 = arith.constant 0 : index
    %16 = vector.load %arg7[%c0_12, %c0_13, %c0_14] : memref<1x1x64xf32, #tpu.memory_space<vmem>>, vector<1x1x64xf32>
    %17 = vector.shape_cast %16 : vector<1x1x64xf32> to vector<1x64xf32>
    %18 = vector.broadcast %17 : vector<1x64xf32> to vector<8x64xf32>
    %19 = arith.addf %15, %18 : vector<8x64xf32>
    %20 = arith.truncf %19 : vector<8x64xf32> to vector<8x64xbf16>
    %c0_15 = arith.constant 0 : index
    %c0_16 = arith.constant 0 : index
    %c0_17 = arith.constant 0 : index
    %21 = vector.load %arg5[%c0_15, %c0_16, %c0_17] : memref<1x64x64xbf16, #tpu.memory_space<vmem>>, vector<1x64x64xbf16>
    %22 = vector.shape_cast %21 : vector<1x64x64xbf16> to vector<64x64xbf16>
    %cst_18 = arith.constant dense<0.000000e+00> : vector<8x64xf32>
    %23 = tpu.matmul %4, %22, %cst_18 {dimension_numbers = #tpu.dot_dimension_numbers<[1], [0], [0], [1], [0, 0, 1, 1], [], []>} : vector<8x64xbf16>, vector<64x64xbf16>, vector<8x64xf32> -> vector<8x64xf32>
    %c0_19 = arith.constant 0 : index
    %c0_20 = arith.constant 0 : index
    %c0_21 = arith.constant 0 : index
    %24 = vector.load %arg8[%c0_19, %c0_20, %c0_21] : memref<1x1x64xf32, #tpu.memory_space<vmem>>, vector<1x1x64xf32>
    %25 = vector.shape_cast %24 : vector<1x1x64xf32> to vector<1x64xf32>
    %26 = vector.broadcast %25 : vector<1x64xf32> to vector<8x64xf32>
    %27 = arith.addf %23, %26 : vector<8x64xf32>
    %28 = arith.truncf %27 : vector<8x64xf32> to vector<8x64xbf16>
    "tpu.trace_start"() <{level = 10 : i32, message = "qd,kd->qk"}> : () -> ()
    %cst_22 = arith.constant dense<0.000000e+00> : vector<8x8xf32>
    %29 = tpu.matmul %12, %20, %cst_22 {dimension_numbers = #tpu.dot_dimension_numbers<[1], [1], [0], [0], [0, 0, 1, 0], [], []>} : vector<8x64xbf16>, vector<8x64xbf16>, vector<8x8xf32> -> vector<8x8xf32>
    "tpu.trace_stop"() : () -> ()
    %cst_23 = arith.constant dense<0xFF800000> : vector<8xf32>
    %30 = vector.multi_reduction <maximumf>, %29, %cst_23 [1] : vector<8x8xf32> to vector<8xf32>
    %31 = vector.shape_cast %30 : vector<8xf32> to vector<8x1xf32>
    %32 = vector.broadcast %31 : vector<8x1xf32> to vector<8x8xf32>
    %33 = arith.subf %29, %32 : vector<8x8xf32>
    %34 = math.exp %33 : vector<8x8xf32>
    %cst_24 = arith.constant dense<0.000000e+00> : vector<8xf32>
    %35 = vector.multi_reduction <add>, %34, %cst_24 [1] : vector<8x8xf32> to vector<8xf32>
    %36 = vector.shape_cast %35 : vector<8xf32> to vector<8x1xf32>
    %37 = tpu.reciprocal %36 {approx = true} : vector<8x1xf32> -> vector<8x1xf32>
    %38 = vector.broadcast %37 : vector<8x1xf32> to vector<8x8xf32>
    %39 = arith.mulf %34, %38 : vector<8x8xf32>
    %40 = arith.truncf %39 : vector<8x8xf32> to vector<8x8xbf16>
    %cst_25 = arith.constant dense<0.000000e+00> : vector<8x64xf32>
    %41 = tpu.matmul %40, %28, %cst_25 {dimension_numbers = #tpu.dot_dimension_numbers<[1], [0], [0], [1], [0, 0, 1, 1], [], []>} : vector<8x8xbf16>, vector<8x64xbf16>, vector<8x64xf32> -> vector<8x64xf32>
    %42 = arith.truncf %41 : vector<8x64xf32> to vector<8x64xbf16>
    %c0_26 = arith.constant 0 : index
    %c0_27 = arith.constant 0 : index
    %c0_28 = arith.constant 0 : index
    %43 = vector.load %arg9[%c0_26, %c0_27, %c0_28] : memref<1x64x64xbf16, #tpu.memory_space<vmem>>, vector<1x64x64xbf16>
    %44 = vector.shape_cast %43 : vector<1x64x64xbf16> to vector<64x64xbf16>
    %cst_29 = arith.constant dense<0.000000e+00> : vector<8x64xf32>
    %45 = tpu.matmul %42, %44, %cst_29 {dimension_numbers = #tpu.dot_dimension_numbers<[1], [0], [0], [1], [0, 0, 1, 1], [], []>} : vector<8x64xbf16>, vector<64x64xbf16>, vector<8x64xf32> -> vector<8x64xf32>
    %c0_30 = arith.constant 0 : index
    %c0_31 = arith.constant 0 : index
    %c0_32 = arith.constant 0 : index
    %46 = vector.load %arg10[%c0_30, %c0_31, %c0_32] : memref<1x1x64xf32, #tpu.memory_space<vmem>>, vector<1x1x64xf32>
    %47 = vector.shape_cast %46 : vector<1x1x64xf32> to vector<1x64xf32>
    %48 = vector.broadcast %47 : vector<1x64xf32> to vector<8x64xf32>
    %49 = arith.addf %45, %48 : vector<8x64xf32>
    %50 = arith.addf %3, %49 : vector<8x64xf32>
    %c0_33 = arith.constant 0 : index
    %c0_34 = arith.constant 0 : index
    %c0_35 = arith.constant 0 : index
    %51 = vector.load %arg11[%c0_33, %c0_34, %c0_35] : memref<1x1x64xf32, #tpu.memory_space<vmem>>, vector<1x1x64xf32>
    %52 = vector.shape_cast %51 : vector<1x1x64xf32> to vector<1x64xf32>
    %c0_36 = arith.constant 0 : index
    %c0_37 = arith.constant 0 : index
    %c0_38 = arith.constant 0 : index
    %53 = vector.load %arg12[%c0_36, %c0_37, %c0_38] : memref<1x1x64xf32, #tpu.memory_space<vmem>>, vector<1x1x64xf32>
    %54 = vector.shape_cast %53 : vector<1x1x64xf32> to vector<1x64xf32>
    %cst_39 = arith.constant dense<0.000000e+00> : vector<8xf32>
    %55 = vector.multi_reduction <add>, %50, %cst_39 [1] : vector<8x64xf32> to vector<8xf32>
    %56 = vector.shape_cast %55 : vector<8xf32> to vector<8x1xf32>
    %cst_40 = arith.constant 6.400000e+01 : f32
    %57 = vector.broadcast %cst_40 : f32 to vector<8x1xf32>
    %58 = arith.divf %56, %57 : vector<8x1xf32>
    %59 = vector.broadcast %58 : vector<8x1xf32> to vector<8x64xf32>
    %60 = arith.subf %50, %59 : vector<8x64xf32>
    %61 = arith.mulf %60, %60 : vector<8x64xf32>
    %cst_41 = arith.constant dense<0.000000e+00> : vector<8xf32>
    %62 = vector.multi_reduction <add>, %61, %cst_41 [1] : vector<8x64xf32> to vector<8xf32>
    %63 = vector.shape_cast %62 : vector<8xf32> to vector<8x1xf32>
    %cst_42 = arith.constant 6.400000e+01 : f32
    %64 = vector.broadcast %cst_42 : f32 to vector<8x1xf32>
    %65 = arith.divf %63, %64 : vector<8x1xf32>
    %66 = vector.broadcast %58 : vector<8x1xf32> to vector<8x64xf32>
    %67 = arith.subf %50, %66 : vector<8x64xf32>
    %cst_43 = arith.constant 9.99999974E-6 : f32
    %68 = vector.broadcast %cst_43 : f32 to vector<8x1xf32>
    %69 = arith.addf %65, %68 : vector<8x1xf32>
    %70 = math.rsqrt %69 : vector<8x1xf32>
    %71 = vector.broadcast %70 : vector<8x1xf32> to vector<8x64xf32>
    %72 = arith.mulf %67, %71 : vector<8x64xf32>
    %73 = vector.broadcast %52 : vector<1x64xf32> to vector<8x64xf32>
    %74 = arith.mulf %72, %73 : vector<8x64xf32>
    %75 = vector.broadcast %54 : vector<1x64xf32> to vector<8x64xf32>
    %76 = arith.addf %74, %75 : vector<8x64xf32>
    %77 = arith.truncf %76 : vector<8x64xf32> to vector<8x64xbf16>
    %c0_44 = arith.constant 0 : index
    %c0_45 = arith.constant 0 : index
    %c0_46 = arith.constant 0 : index
    %78 = vector.load %arg13[%c0_44, %c0_45, %c0_46] : memref<1x64x64xbf16, #tpu.memory_space<vmem>>, vector<1x64x64xbf16>
    %79 = vector.shape_cast %78 : vector<1x64x64xbf16> to vector<64x64xbf16>
    %cst_47 = arith.constant dense<0.000000e+00> : vector<8x64xf32>
    %80 = tpu.matmul %77, %79, %cst_47 {dimension_numbers = #tpu.dot_dimension_numbers<[1], [0], [0], [1], [0, 0, 1, 1], [], []>} : vector<8x64xbf16>, vector<64x64xbf16>, vector<8x64xf32> -> vector<8x64xf32>
    %c0_48 = arith.constant 0 : index
    %c0_49 = arith.constant 0 : index
    %c0_50 = arith.constant 0 : index
    %81 = vector.load %arg14[%c0_48, %c0_49, %c0_50] : memref<1x1x64xf32, #tpu.memory_space<vmem>>, vector<1x1x64xf32>
    %82 = vector.shape_cast %81 : vector<1x1x64xf32> to vector<1x64xf32>
    %83 = vector.broadcast %82 : vector<1x64xf32> to vector<8x64xf32>
    %84 = arith.addf %80, %83 : vector<8x64xf32>
    %cst_51 = arith.constant 0.000000e+00 : f32
    %85 = vector.broadcast %cst_51 : f32 to vector<8x64xf32>
    %86 = arith.maximumf %84, %85 : vector<8x64xf32>
    %87 = arith.truncf %86 : vector<8x64xf32> to vector<8x64xbf16>
    %c0_52 = arith.constant 0 : index
    %c0_53 = arith.constant 0 : index
    %c0_54 = arith.constant 0 : index
    %88 = vector.load %arg15[%c0_52, %c0_53, %c0_54] : memref<1x64x64xbf16, #tpu.memory_space<vmem>>, vector<1x64x64xbf16>
    %89 = vector.shape_cast %88 : vector<1x64x64xbf16> to vector<64x64xbf16>
    %cst_55 = arith.constant dense<0.000000e+00> : vector<8x64xf32>
    %90 = tpu.matmul %87, %89, %cst_55 {dimension_numbers = #tpu.dot_dimension_numbers<[1], [0], [0], [1], [0, 0, 1, 1], [], []>} : vector<8x64xbf16>, vector<64x64xbf16>, vector<8x64xf32> -> vector<8x64xf32>
    %c0_56 = arith.constant 0 : index
    %c0_57 = arith.constant 0 : index
    %c0_58 = arith.constant 0 : index
    %91 = vector.load %arg16[%c0_56, %c0_57, %c0_58] : memref<1x1x64xf32, #tpu.memory_space<vmem>>, vector<1x1x64xf32>
    %92 = vector.shape_cast %91 : vector<1x1x64xf32> to vector<1x64xf32>
    %93 = vector.broadcast %92 : vector<1x64xf32> to vector<8x64xf32>
    %94 = arith.addf %90, %93 : vector<8x64xf32>
    %95 = arith.addf %76, %94 : vector<8x64xf32>
    %c0_59 = arith.constant 0 : index
    %c0_60 = arith.constant 0 : index
    %c0_61 = arith.constant 0 : index
    %96 = vector.load %arg17[%c0_59, %c0_60, %c0_61] : memref<1x1x64xf32, #tpu.memory_space<vmem>>, vector<1x1x64xf32>
    %97 = vector.shape_cast %96 : vector<1x1x64xf32> to vector<1x64xf32>
    %c0_62 = arith.constant 0 : index
    %c0_63 = arith.constant 0 : index
    %c0_64 = arith.constant 0 : index
    %98 = vector.load %arg18[%c0_62, %c0_63, %c0_64] : memref<1x1x64xf32, #tpu.memory_space<vmem>>, vector<1x1x64xf32>
    %99 = vector.shape_cast %98 : vector<1x1x64xf32> to vector<1x64xf32>
    %cst_65 = arith.constant dense<0.000000e+00> : vector<8xf32>
    %100 = vector.multi_reduction <add>, %95, %cst_65 [1] : vector<8x64xf32> to vector<8xf32>
    %101 = vector.shape_cast %100 : vector<8xf32> to vector<8x1xf32>
    %cst_66 = arith.constant 6.400000e+01 : f32
    %102 = vector.broadcast %cst_66 : f32 to vector<8x1xf32>
    %103 = arith.divf %101, %102 : vector<8x1xf32>
    %104 = vector.broadcast %103 : vector<8x1xf32> to vector<8x64xf32>
    %105 = arith.subf %95, %104 : vector<8x64xf32>
    %106 = arith.mulf %105, %105 : vector<8x64xf32>
    %cst_67 = arith.constant dense<0.000000e+00> : vector<8xf32>
    %107 = vector.multi_reduction <add>, %106, %cst_67 [1] : vector<8x64xf32> to vector<8xf32>
    %108 = vector.shape_cast %107 : vector<8xf32> to vector<8x1xf32>
    %cst_68 = arith.constant 6.400000e+01 : f32
    %109 = vector.broadcast %cst_68 : f32 to vector<8x1xf32>
    %110 = arith.divf %108, %109 : vector<8x1xf32>
    %111 = vector.broadcast %103 : vector<8x1xf32> to vector<8x64xf32>
    %112 = arith.subf %95, %111 : vector<8x64xf32>
    %cst_69 = arith.constant 9.99999974E-6 : f32
    %113 = vector.broadcast %cst_69 : f32 to vector<8x1xf32>
    %114 = arith.addf %110, %113 : vector<8x1xf32>
    %115 = math.rsqrt %114 : vector<8x1xf32>
    %116 = vector.broadcast %115 : vector<8x1xf32> to vector<8x64xf32>
    %117 = arith.mulf %112, %116 : vector<8x64xf32>
    %118 = vector.broadcast %97 : vector<1x64xf32> to vector<8x64xf32>
    %119 = arith.mulf %117, %118 : vector<8x64xf32>
    %120 = vector.broadcast %99 : vector<1x64xf32> to vector<8x64xf32>
    %121 = arith.addf %119, %120 : vector<8x64xf32>
    %c0_70 = arith.constant 0 : index
    %c0_71 = arith.constant 0 : index
    %122 = vector.load %arg20[%c0_70, %c0_71] : memref<8x64xf32, #tpu.memory_space<vmem>>, vector<8x64xf32>
    tpu.vector_store %arg20[%c0_70, %c0_71], %121 {strides = array<i32>} : memref<8x64xf32, #tpu.memory_space<vmem>>, vector<8x64xf32>,
    %c5_i32 = arith.constant 5 : i32
    %123 = arith.cmpi eq, %arg1, %c5_i32 : i32
    %124 = arith.extui %123 : i1 to i32
    %c0_i32_72 = arith.constant 0 : i32
    %125 = arith.cmpi ne, %124, %c0_i32_72 : i32
    scf.if %125 {
      %c0_73 = arith.constant 0 : index
      %c0_74 = arith.constant 0 : index
      %c0_75 = arith.constant 0 : index
      %126 = vector.load %arg19[%c0_73, %c0_74, %c0_75] : memref<1x8x64xf32, #tpu.memory_space<vmem>>, vector<1x8x64xf32>
      %127 = vector.shape_cast %126 : vector<1x8x64xf32> to vector<8x64xf32>
      %128 = vector.shape_cast %121 : vector<8x64xf32> to vector<1x8x64xf32>
      tpu.vector_store %arg19[%c0_73, %c0_74, %c0_75], %128 {strides = array<i32>} : memref<1x8x64xf32, #tpu.memory_space<vmem>>, vector<1x8x64xf32>,
    } else {
    }
    return
  }
  func.func @transform_0(%arg0: i32, %arg1: i32) -> (i32, i32, i32) {
    %c0_i32 = arith.constant 0 : i32
    %c0_i32_0 = arith.constant 0 : i32
    %c0_i32_1 = arith.constant 0 : i32
    return %arg0, %c0_i32, %c0_i32_0 : i32, i32, i32
  }
  func.func @transform_1(%arg0: i32, %arg1: i32) -> (i32, i32, i32) {
    %c0_i32 = arith.constant 0 : i32
    %c0_i32_0 = arith.constant 0 : i32
    %c0_i32_1 = arith.constant 0 : i32
    return %arg1, %c0_i32, %c0_i32_0 : i32, i32, i32
  }
  func.func @transform_2(%arg0: i32, %arg1: i32) -> (i32, i32, i32) {
    %c0_i32 = arith.constant 0 : i32
    %c0_i32_0 = arith.constant 0 : i32
    %c0_i32_1 = arith.constant 0 : i32
    return %arg1, %c0_i32, %c0_i32_0 : i32, i32, i32
  }
  func.func @transform_3(%arg0: i32, %arg1: i32) -> (i32, i32, i32) {
    %c0_i32 = arith.constant 0 : i32
    %c0_i32_0 = arith.constant 0 : i32
    %c0_i32_1 = arith.constant 0 : i32
    return %arg1, %c0_i32, %c0_i32_0 : i32, i32, i32
  }
  func.func @transform_4(%arg0: i32, %arg1: i32) -> (i32, i32, i32) {
    %c0_i32 = arith.constant 0 : i32
    %c0_i32_0 = arith.constant 0 : i32
    %c0_i32_1 = arith.constant 0 : i32
    return %arg1, %c0_i32, %c0_i32_0 : i32, i32, i32
  }
  func.func @transform_5(%arg0: i32, %arg1: i32) -> (i32, i32, i32) {
    %c0_i32 = arith.constant 0 : i32
    %c0_i32_0 = arith.constant 0 : i32
    %c0_i32_1 = arith.constant 0 : i32
    return %arg1, %c0_i32, %c0_i32_0 : i32, i32, i32
  }
  func.func @transform_6(%arg0: i32, %arg1: i32) -> (i32, i32, i32) {
    %c0_i32 = arith.constant 0 : i32
    %c0_i32_0 = arith.constant 0 : i32
    %c0_i32_1 = arith.constant 0 : i32
    return %arg1, %c0_i32, %c0_i32_0 : i32, i32, i32
  }
  func.func @transform_7(%arg0: i32, %arg1: i32) -> (i32, i32, i32) {
    %c0_i32 = arith.constant 0 : i32
    %c0_i32_0 = arith.constant 0 : i32
    %c0_i32_1 = arith.constant 0 : i32
    return %arg1, %c0_i32, %c0_i32_0 : i32, i32, i32
  }
  func.func @transform_8(%arg0: i32, %arg1: i32) -> (i32, i32, i32) {
    %c0_i32 = arith.constant 0 : i32
    %c0_i32_0 = arith.constant 0 : i32
    %c0_i32_1 = arith.constant 0 : i32
    return %arg1, %c0_i32, %c0_i32_0 : i32, i32, i32
  }
  func.func @transform_9(%arg0: i32, %arg1: i32) -> (i32, i32, i32) {
    %c0_i32 = arith.constant 0 : i32
    %c0_i32_0 = arith.constant 0 : i32
    %c0_i32_1 = arith.constant 0 : i32
    return %arg1, %c0_i32, %c0_i32_0 : i32, i32, i32
  }
  func.func @transform_10(%arg0: i32, %arg1: i32) -> (i32, i32, i32) {
    %c0_i32 = arith.constant 0 : i32
    %c0_i32_0 = arith.constant 0 : i32
    %c0_i32_1 = arith.constant 0 : i32
    return %arg1, %c0_i32, %c0_i32_0 : i32, i32, i32
  }
  func.func @transform_11(%arg0: i32, %arg1: i32) -> (i32, i32, i32) {
    %c0_i32 = arith.constant 0 : i32
    %c0_i32_0 = arith.constant 0 : i32
    %c0_i32_1 = arith.constant 0 : i32
    return %arg1, %c0_i32, %c0_i32_0 : i32, i32, i32
  }
  func.func @transform_12(%arg0: i32, %arg1: i32) -> (i32, i32, i32) {
    %c0_i32 = arith.constant 0 : i32
    %c0_i32_0 = arith.constant 0 : i32
    %c0_i32_1 = arith.constant 0 : i32
    return %arg1, %c0_i32, %c0_i32_0 : i32, i32, i32
  }
  func.func @transform_13(%arg0: i32, %arg1: i32) -> (i32, i32, i32) {
    %c0_i32 = arith.constant 0 : i32
    %c0_i32_0 = arith.constant 0 : i32
    %c0_i32_1 = arith.constant 0 : i32
    return %arg1, %c0_i32, %c0_i32_0 : i32, i32, i32
  }
  func.func @transform_14(%arg0: i32, %arg1: i32) -> (i32, i32, i32) {
    %c0_i32 = arith.constant 0 : i32
    %c0_i32_0 = arith.constant 0 : i32
    %c0_i32_1 = arith.constant 0 : i32
    return %arg1, %c0_i32, %c0_i32_0 : i32, i32, i32
  }
  func.func @transform_15(%arg0: i32, %arg1: i32) -> (i32, i32, i32) {
    %c0_i32 = arith.constant 0 : i32
    %c0_i32_0 = arith.constant 0 : i32
    %c0_i32_1 = arith.constant 0 : i32
    return %arg1, %c0_i32, %c0_i32_0 : i32, i32, i32
  }
  func.func @transform_16(%arg0: i32, %arg1: i32) -> (i32, i32, i32) {
    %c0_i32 = arith.constant 0 : i32
    %c0_i32_0 = arith.constant 0 : i32
    %c0_i32_1 = arith.constant 0 : i32
    return %arg1, %c0_i32, %c0_i32_0 : i32, i32, i32
  }
  func.func @transform_17(%arg0: i32, %arg1: i32) -> (i32, i32, i32) {
    %c0_i32 = arith.constant 0 : i32
    %c0_i32_0 = arith.constant 0 : i32
    %c0_i32_1 = arith.constant 0 : i32
    return %arg0, %c0_i32, %c0_i32_0 : i32, i32, i32
  }
}

</mosaic_0001>

<bundles_post_ra>
// kernel: tpu_custom_call.1
= control target key start
LH: loop header
LB: loop body
LE: loop exit
PB: predicated region body
PF: predicated region fallthrough
CT: control target
= control target key end

     0   :  { %s3482_s0 = inlined_call_operand.hbm [shape: f32[2,8,64], index: 0, kind: input, shape index: {}]   ;;  %s3483_s1 = inlined_call_operand.hbm [shape: bf16[6,64,64], index: 1, kind: input, shape index: {}]   ;;  %s3484_s2 = inlined_call_operand.hbm [shape: bf16[6,64,64], index: 2, kind: input, shape index: {}]   ;;  %s3485_s3 = inlined_call_operand.hbm [shape: bf16[6,64,64], index: 3, kind: input, shape index: {}]   ;;  %s3486_s4 = inlined_call_operand.hbm [shape: f32[6,1,64], index: 4, kind: input, shape index: {}]   ;;  %s3487_s5 = inlined_call_operand.hbm [shape: f32[6,1,64], index: 5, kind: input, shape index: {}]   ;;  %s3488_s6 = inlined_call_operand.hbm [shape: f32[6,1,64], index: 6, kind: input, shape index: {}]   ;;  %s3489_s7 = inlined_call_operand.hbm [shape: bf16[6,64,64], index: 7, kind: input, shape index: {}]   ;;  %s3490_s8 = inlined_call_operand.vmem [shape: f32[6,1,64], index: 8, kind: input, shape index: {}]   ;;  %s3491_s9 = inlined_call_operand.hbm [shape: f32[6,1,64], index: 9, kind: input, shape index: {}]   ;;  %s3492_s10 = inlined_call_operand.hbm [shape: f32[6,1,64], index: 10, kind: input, shape index: {}]   ;;  %s3493_s11 = inlined_call_operand.hbm [shape: bf16[6,64,64], index: 11, kind: input, shape index: {}]   ;;  %s3494_s12 = inlined_call_operand.hbm [shape: f32[6,1,64], index: 12, kind: input, shape index: {}]   ;;  %s3495_s13 = inlined_call_operand.hbm [shape: bf16[6,64,64], index: 13, kind: input, shape index: {}]   ;;  %s3496_s14 = inlined_call_operand.vmem [shape: f32[6,1,64], index: 14, kind: input, shape index: {}]   ;;  %s3497_s15 = inlined_call_operand.hbm [shape: f32[6,1,64], index: 15, kind: input, shape index: {}]   ;;  %s3498_s16 = inlined_call_operand.hbm [shape: f32[6,1,64], index: 16, kind: input, shape index: {}]   ;;  %s3499_s17 = inlined_call_operand.hbm [shape: f32[2,8,64], index: 17, kind: output, shape index: {}]  }
   0x1   :  { %3529 = sst [smem:[#allocation52_spill]] %s3482_s0 }
   0x2   :  { %3530 = sst [smem:[#allocation53_spill]] %s3483_s1 }
   0x3   :  { %3531 = sst [smem:[#allocation54_spill]] %s3484_s2 }
   0x4   :  { %3532 = sst [smem:[#allocation55_spill]] %s3485_s3 }
   0x5   :  { %3533 = sst [smem:[#allocation56_spill]] %s3486_s4 }
   0x6   :  { %3534 = sst [smem:[#allocation57_spill]] %s3487_s5 }
   0x7   :  { %3535 = sst [smem:[#allocation58_spill]] %s3490_s8 }
   0x8   :  { %3536 = sst [smem:[#allocation59_spill]] %s3491_s9 }
   0x9   :  { %3537 = sst [smem:[#allocation60_spill]] %s3493_s11 }
   0xa   :  { %3538 = sst [smem:[#allocation61_spill]] %s3495_s13 }
   0xb   :  { %3539 = sst [smem:[#allocation62_spill]] %s3496_s14 }
   0xc   :  { %3540 = sst [smem:[#allocation63_spill]] %s3498_s16 }
   0xd   :  { %3541 = sst [smem:[#allocation64_spill]] %s3499_s17 }
   0xe   :  { %22 = vsyncpa [#allocation4], 0 }
   0xf   :  { %24 = vsyncpa [#allocation4 + $0x1], 0 }
  0x10   :  { %25 = vsyncpa [#allocation7], 0 }
  0x11   :  { %27 = vsyncpa [#allocation7 + $0x1], 0 }
  0x12   :  { %28 = vsyncpa [#allocation10], 0 }
  0x13   :  { %30 = vsyncpa [#allocation10 + $0x1], 0 }
  0x14   :  { %31 = vsyncpa [#allocation13], 0 }
  0x15   :  { %33 = vsyncpa [#allocation13 + $0x1], 0 }
  0x16   :  { %34 = vsyncpa [#allocation16], 0 }
  0x17   :  { %36 = vsyncpa [#allocation16 + $0x1], 0 }
  0x18   :  { %37 = vsyncpa [#allocation19], 0 }
  0x19   :  { %39 = vsyncpa [#allocation19 + $0x1], 0 }
  0x1a   :  { %40 = vsyncpa [#allocation22], 0 }
  0x1b   :  { %42 = vsyncpa [#allocation22 + $0x1], 0 }
  0x1c   :  { %43 = vsyncpa [#allocation25], 0 }
  0x1d   :  { %45 = vsyncpa [#allocation25 + $0x1], 0 }
  0x1e   :  { %46 = vsyncpa [#allocation5], 0 }
  0x1f   :  { %48 = vsyncpa [#allocation5 + $0x1], 0  ;;  %s2942_s24 = smov 0   ;;  %s2944_s25 = smov 0  }
  0x20   :  { %s2946_s26 = smov 0   ;;  %s2948_s27 = smov 0  }
  0x21   :  { %s2950_s28 = smov 0   ;;  %s2952_s29 = smov 0  }
  0x22   :  { %s2954_s0 = smov 0   ;;  %s2956_s30 = smov 0  }
  0x23   :  { %s2958_s18 = smov 0   ;;  %s2960_s19 = smov 0  }
  0x24   :  { %s2962_s1 = smov 0  }
  0x25 LB: > { %3542 = sst [smem:[#allocation37_spill]] %s2811_s25  ;;  %s2998_s20 = sadd.s32 4294967295, %s2847_s1   ;;  %s2847_s1 = sphi %s2962_s1, %s54_s1   ;;  %s2843_s19 = sphi %s2960_s19, %s3619_s19   ;;  %s2839_s18 = sphi %s2958_s18, %s3618_s18   ;;  %s2835_s30 = sphi %s2956_s30, %s3617_s30   ;;  %s2831_s0 = sphi %s2954_s0, %s3616_s0   ;;  %s2827_s29 = sphi %s2952_s29, %s3615_s29   ;;  %s2823_s28 = sphi %s2950_s28, %s3614_s28   ;;  %s2819_s27 = sphi %s2948_s27, %s3610_s27   ;;  %s2815_s26 = sphi %s2946_s26, %s3609_s26   ;;  %s2811_s25 = sphi %s2944_s25, %s3608_s25   ;;  %s2807_s24 = sphi %s2942_s24, %s3607_s24  }
  0x26   : > { %3543 = sst [smem:[#allocation38_spill]] %s2815_s26  ;;  %s1957_s21 = sadd.s32 4294967294, %s2847_s1  }
  0x27   : > { %3544 = sst [smem:[#allocation39_spill]] %s2819_s27  ;;  %s63_s22 = sadd.s32 1, %s2839_s18 }
  0x28   : > { %3545 = sst [smem:[#allocation40_spill]] %s2823_s28  ;;  %s66_s23 = sadd.s32 1, %s2843_s19 }
  0x29   : > { %3546 = sst [smem:[#allocation41_spill]] %s2831_s0  ;;  %p64_p0 = scmp.ge.s32.totalorder %s63_s22, 6 }
  0x2a   : > { %3547 = sst [smem:[#allocation42_spill]] %s2835_s30  ;;  %s73_s17 = sadd.s32 1, %s2827_s29 }
  0x2b   : > { %3548 = sst [smem:[#allocation43_spill]] %s2998_s20  ;;  %p80_p1 = scmp.ne.s32.totalorder %s2827_s29, %s2823_s28 }
  0x2c   : > { %p81_p2 = scmp.eq.s32.totalorder %s2847_s1, 0  ;;  %s3621_s22 = smov (%p64_p0, %s63_s22), 0 }
  0x2d   : > { %3549 = sst [smem:[#allocation44_spill]] %s3621_s22  ;;  %s3623_s23 = smov (!%p64_p0, %s66_s23), %s2843_s19 }
  0x2e   : > { %p3015_p3 = por %p81_p2, %p80_p1  ;;  %p3503_p4 = scmp.ne.s32.totalorder %s2823_s28, %s2819_s27 }
  0x2f   : > { %p68_p5 = scmp.ge.s32.totalorder %s3623_s23, 2  ;;  %p87_p6 = scmp.eq.s32.totalorder %s2998_s20, 0 }
  0x30   : > { %s96_s14 = ssub.s32 %s2839_s18, %s3621_s22  ;;  %s99_s8 = sadd.s32 1, %s2815_s26 }
  0x31   : > { %s3625_s23 = smov (%p68_p5, %s3623_s23), 0  ;;  %p3032_p7 = por %p87_p6, %p3503_p4 }
  0x32   : > { %3551 = sst [smem:[#allocation45_spill]] %s3625_s23  ;;  %p97_p8 = scmp.eq.s32.totalorder %s96_s14, 0 }
  0x33   : > { %s3552_s0 = scalar_select %p3032_p7, 1, 0 }
  0x34   : > { %s70_s16 = ssub.s32 %s2843_s19, %s3625_s23  ;;  %p106_p9 = scmp.ne.s32.totalorder %s2815_s26, %s2811_s25 }
  0x35   : > { %3553 = sst [smem:[#allocation46_spill]] %s3552_s0  ;;  %p71_p10 = scmp.eq.s32.totalorder %s70_s16, 0 }
  0x36   : > { %p112_p11 = scmp.ne.s32.totalorder %s2811_s25, %s2807_s24  ;;  %p3050_p12 = por %p106_p9, %p81_p2 }
  0x37   : > { %s3043_s13 = scalar_select %p97_p8, %s2815_s26, %s99_s8  }
  0x38   : > { %s3046_s22 = scalar_select %p71_p10, %s2827_s29, %s73_s17  }
  0x39   : > { %3554 = sst [smem:[#allocation47_spill]] %s3043_s13  ;;  %p3056_p13 = por %p112_p11, %p87_p6 }
  0x3a   : > { %3555 = sst [smem:[#allocation48_spill]] %s3046_s22  ;;  %p526_p0 = scmp.eq.s32.totalorder %s2998_s20, 11 }
  0x3b   : > { %s3557_s9 = scalar_select %p3056_p13, 1, 0 }
  0x3c   : > { %p532_p5 = scmp.eq.s32.totalorder %s1957_s21, 11  ;;  %p3064_p4 = por %p526_p0, %p80_p1 }
  0x3d   : > { %3558 = sst [smem:[#allocation49_spill]] %s3557_s9  ;;  %p3561_p8 = scmp.ne.s32.totalorder %s2823_s28, %s2819_s27 }
  0x3e   : > { %s3559_s14 = scalar_select %p3064_p4, 1, 0 }
  0x3f   : > { %p3071_p10 = por %p532_p5, %p3561_p8  ;;  %p1959_p2 = scmp.ge.s32.totalorder %s2847_s1, 12 }
  0x40   : > { %3560 = sst [smem:[#allocation50_spill]] %s3559_s14  ;;  %s3077_s16 = sand.u32 (!%p1959_p2), 1, %s2847_s1  }
  0x41   : > { %s3562_s8 = scalar_select %p3071_p10, 1, 0 }
  0x42   : > { %548 = sbr.rel (%p1959_p2) target bundleno = 130 (0x82), region = 16  ;;  %s3080_s17 = sand.u32 (!%p1959_p2), 1, %s2815_s26  }
  0x43   : > { %3563 = sst [smem:[#allocation51_spill]] %s3562_s8  ;;  %s3083_s24 = sshll.u32 (!%p1959_p2), %s3080_s17, 5 }
  0x44   : > { %s3086_s21 = sshll.u32 (!%p1959_p2), %s2839_s18, 5  ;;  %s3564_s13 = sld [smem:[#allocation53_spill]] (!%p1959_p2) }
  0x45   : > { %s575_s27 = scalar_lea.vmem (!%p1959_p2), [#allocation6], %s3083_s24  ;;  %s3517_s9 = scalar_lea.sflag (!%p1959_p2), [#allocation7], %s3077_s16 }
  0x46   : > { %s583_s14 = sshll.u32 (!%p1959_p2), %s575_s27, 4  ;;  %s3521_s25 = smov (!%p1959_p2), 64   ;;  %s584_s14 = int_to_ptr.vmem [resolvable:$true] %s583_s14 }
  0x47   : > { %s3525_s20 = smov 4   ;;  %s3565_s3 = sld [smem:[#allocation55_spill]] }
  0x48   : > { %s3518_s28 = scalar_lea.sflag [#allocation10], %s3077_s16  ;;  %s3566_s5 = sld [smem:[#allocation57_spill]] }
  0x49   : > { %s657_s22 = scalar_lea.vmem [#allocation12], %s3080_s17  ;;  %s3568_s2 = sld [smem:[#allocation54_spill]] }
  0x4a   : > { %s580_s8 = scalar_lea.hbm %s3564_s13, %s3086_s21  ;;  %s3572_s4 = sld [smem:[#allocation56_spill]] }
  0x4b   : > { %s581_s26 = sshll.u32 %s580_s8, 4  ;;  %s619_s8 = scalar_lea.vmem [#allocation9], %s3083_s24  ;;  %s582_s26 = int_to_ptr.hbm [resolvable:$true] %s581_s26 }
  0x4c   : > { %2130 = dma.hbm_to_vmem [thread:$0]  (%p3050_p12), %s582_s26, 512, %s584_s14, %s3517_s9, %s3521_s25, %s3521_s25, %s3525_s20  }
  0x4d   : > { %s624_s27 = scalar_lea.hbm %s3565_s3, %s3086_s21  ;;  %s627_s0 = sshll.u32 %s619_s8, 4  ;;  %s628_s0 = int_to_ptr.vmem [resolvable:$true] %s627_s0 }
  0x4e   : > { %s625_s23 = sshll.u32 %s624_s27, 4  ;;  %s660_s13 = scalar_lea.hbm %s3566_s5, %s2839_s18  ;;  %s626_s23 = int_to_ptr.hbm [resolvable:$true] %s625_s23 }
  0x4f   : > { %2132 = dma.hbm_to_vmem [thread:$0]  (%p3050_p12), %s626_s23, 512, %s628_s0, %s3518_s28, %s3521_s25, %s3521_s25, %s3525_s20  }
  0x50   : > { %s664_s27 = sshll.u32 %s657_s22, 4  ;;  %s662_s8 = sshll.u32 %s660_s13, 4  ;;  %s665_s27 = int_to_ptr.vmem [resolvable:$true] %s664_s27  ;;  %s663_s8 = int_to_ptr.hbm [resolvable:$true] %s662_s8 }
  0x51   : > { %s3519_s9 = scalar_lea.sflag [#allocation13], %s3077_s16  ;;  %s697_s23 = scalar_lea.hbm %s3489_s7, %s3086_s21 }
  0x52   : > { %2134 = dma.hbm_to_vmem [thread:$0]  (%p3050_p12), %s663_s8, 16, %s665_s27, %s3519_s9  }
  0x53   : > { %s698_s26 = sshll.u32 %s697_s23, 4  ;;  %s692_s14 = scalar_lea.vmem [#allocation15], %s3083_s24  ;;  %s699_s26 = int_to_ptr.hbm [resolvable:$true] %s698_s26 }
  0x54   : > { %s700_s28 = sshll.u32 %s692_s14, 4  ;;  %s3520_s13 = scalar_lea.sflag [#allocation16], %s3077_s16  ;;  %s701_s28 = int_to_ptr.vmem [resolvable:$true] %s700_s28 }
  0x55   : > { %2136 = dma.hbm_to_vmem [thread:$0]  (%p3050_p12), %s699_s26, 512, %s701_s28, %s3520_s13, %s3521_s25, %s3521_s25, %s3525_s20  }
  0x56   : > { %s739_s27 = scalar_lea.hbm %s3492_s10, %s2839_s18  ;;  %s736_s8 = scalar_lea.vmem [#allocation18], %s3080_s17 }
  0x57   : > { %s743_s0 = sshll.u32 %s736_s8, 4  ;;  %s741_s23 = sshll.u32 %s739_s27, 4  ;;  %s744_s0 = int_to_ptr.vmem [resolvable:$true] %s743_s0  ;;  %s742_s23 = int_to_ptr.hbm [resolvable:$true] %s741_s23 }
  0x58   : > { %s3523_s14 = scalar_lea.sflag [#allocation19], %s3077_s16  ;;  %s778_s26 = scalar_lea.hbm %s3494_s12, %s2839_s18 }
  0x59   : > { %2138 = dma.hbm_to_vmem [thread:$0]  (%p3050_p12), %s742_s23, 16, %s744_s0, %s3523_s14  }
  0x5a   : > { %s780_s22 = sshll.u32 %s778_s26, 4  ;;  %s775_s3 = scalar_lea.vmem [#allocation21], %s3080_s17  ;;  %s781_s22 = int_to_ptr.hbm [resolvable:$true] %s780_s22 }
  0x5b   : > { %s782_s13 = sshll.u32 %s775_s3, 4  ;;  %s3524_s27 = scalar_lea.sflag [#allocation22], %s3077_s16  ;;  %s783_s13 = int_to_ptr.vmem [resolvable:$true] %s782_s13 }
  0x5c   : > { %2140 = dma.hbm_to_vmem [thread:$0]  (%p3050_p12), %s781_s22, 16, %s783_s13, %s3524_s27  }
  0x5d   : > { %s823_s0 = scalar_lea.hbm %s3497_s15, %s2839_s18  ;;  %s820_s23 = scalar_lea.vmem [#allocation24], %s3080_s17 }
  0x5e   : > { %s827_s9 = sshll.u32 %s820_s23, 4  ;;  %s825_s28 = sshll.u32 %s823_s0, 4  ;;  %s828_s9 = int_to_ptr.vmem [resolvable:$true] %s827_s9  ;;  %s826_s28 = int_to_ptr.hbm [resolvable:$true] %s825_s28 }
  0x5f   : > { %s552_s26 = sand.u32 1, %s2827_s29   ;;  %s3527_s3 = scalar_lea.sflag [#allocation25], %s3077_s16 }
  0x60   : > { %2142 = dma.hbm_to_vmem [thread:$0]  (%p3050_p12), %s826_s28, 16, %s828_s9, %s3527_s3  }
  0x61   : > { %s1960_s14 = sshll.u32 %s552_s26, 3  ;;  %s1961_s13 = sshll.u32 %s2843_s19, 3 }
  0x62   : > { %s3567_s8 = sld [smem:[#allocation52_spill]]  ;;  %s556_s0 = scalar_lea.vmem [#allocation3], %s1960_s14 }
  0x63   : > { %s564_s27 = sshll.u32 %s556_s0, 4  ;;  %s553_s5 = scalar_lea.sflag [#allocation4], %s552_s26  ;;  %s565_s27 = int_to_ptr.vmem [resolvable:$true] %s564_s27 }
  0x64   : > { %s602_s3 = scalar_lea.hbm %s3568_s2, %s3086_s21  ;;  %s597_s22 = scalar_lea.vmem [#allocation8], %s3083_s24 }
  0x65   : > { %s605_s25 = sshll.u32 %s597_s22, 4  ;;  %s3569_s14 = smov 4   ;;  %s606_s25 = int_to_ptr.vmem [resolvable:$true] %s605_s25 }
  0x66   : > { %s3571_s26 = scalar_lea.sflag [#allocation7], %s3077_s16  ;;  %s677_s22 = scalar_lea.hbm %s3488_s6, %s2839_s18 }
  0x67   : > { %s3576_s28 = scalar_lea.sflag [#allocation16], %s3077_s16  ;;  %s3577_s2 = sld [smem:[#allocation60_spill]] }
  0x68   : > { %s560_s23 = scalar_lea.hbm %s3567_s8, %s1961_s13  ;;  %s603_s13 = sshll.u32 %s602_s3, 4  ;;  %s604_s13 = int_to_ptr.hbm [resolvable:$true] %s603_s13 }
  0x69   : > { %s562_s20 = sshll.u32 %s560_s23, 4  ;;  %s3570_s8 = smov 64   ;;  %s563_s20 = int_to_ptr.hbm [resolvable:$true] %s562_s20 }
  0x6a   : > { %2129 = dma.hbm_to_vmem [thread:$0]  (%p3015_p3), %s563_s20, 128, %s565_s27, %s553_s5  }
  0x6b   : > { %2131 = dma.hbm_to_vmem [thread:$0]  (%p3050_p12), %s604_s13, 512, %s606_s25, %s3571_s26, %s3570_s8, %s3570_s8, %s3569_s14  }
  0x6c   : > { %s643_s20 = scalar_lea.hbm %s3572_s4, %s2839_s18  ;;  %s640_s27 = scalar_lea.vmem [#allocation11], %s3080_s17 }
  0x6d   : > { %s647_s23 = sshll.u32 %s640_s27, 4  ;;  %s645_s0 = sshll.u32 %s643_s20, 4  ;;  %s648_s23 = int_to_ptr.vmem [resolvable:$true] %s647_s23  ;;  %s646_s0 = int_to_ptr.hbm [resolvable:$true] %s645_s0 }
  0x6e   : > { %s3573_s3 = scalar_lea.sflag [#allocation10], %s3077_s16  ;;  %s674_s25 = scalar_lea.vmem [#allocation14], %s3080_s17 }
  0x6f   : > { %2133 = dma.hbm_to_vmem [thread:$0]  (%p3050_p12), %s646_s0, 16, %s648_s23, %s3573_s3  }
  0x70   : > { %s681_s13 = sshll.u32 %s674_s25, 4  ;;  %s679_s26 = sshll.u32 %s677_s22, 4  ;;  %s682_s13 = int_to_ptr.vmem [resolvable:$true] %s681_s13  ;;  %s680_s26 = int_to_ptr.hbm [resolvable:$true] %s679_s26 }
  0x71   : > { %s3574_s5 = scalar_lea.sflag [#allocation13], %s3077_s16  ;;  %s3575_s27 = sld [smem:[#allocation59_spill]] }
  0x72   : > { %2135 = dma.hbm_to_vmem [thread:$0]  (%p3050_p12), %s680_s26, 16, %s682_s13, %s3574_s5  }
  0x73   : > { %s719_s0 = scalar_lea.vmem [#allocation17], %s3080_s17  ;;  %s759_s13 = scalar_lea.hbm %s3577_s2, %s3086_s21 }
  0x74   : > { %s726_s3 = sshll.u32 %s719_s0, 4  ;;  %s754_s26 = scalar_lea.vmem [#allocation20], %s3083_s24  ;;  %s727_s3 = int_to_ptr.vmem [resolvable:$true] %s726_s3 }
  0x75   : > { %s762_s5 = sshll.u32 %s754_s26, 4  ;;  %s760_s30 = sshll.u32 %s759_s13, 4  ;;  %s763_s5 = int_to_ptr.vmem [resolvable:$true] %s762_s5  ;;  %s761_s30 = int_to_ptr.hbm [resolvable:$true] %s760_s30 }
  0x76   : > { %s3578_s20 = scalar_lea.sflag [#allocation19], %s3077_s16  ;;  %s3579_s0 = sld [smem:[#allocation61_spill]] }
  0x77   : > { %s722_s23 = scalar_lea.hbm %s3575_s27, %s2839_s18  ;;  %s3580_s22 = scalar_lea.sflag [#allocation22], %s3077_s16 }
  0x78   : > { %s724_s9 = sshll.u32 %s722_s23, 4  ;;  %s3581_s26 = sld [smem:[#allocation63_spill]]  ;;  %s725_s9 = int_to_ptr.hbm [resolvable:$true] %s724_s9 }
  0x79   : > { %2137 = dma.hbm_to_vmem [thread:$0]  (%p3050_p12), %s725_s9, 16, %s727_s3, %s3576_s28  }
  0x7a   : > { %2139 = dma.hbm_to_vmem [thread:$0]  (%p3050_p12), %s761_s30, 512, %s763_s5, %s3578_s20, %s3570_s8, %s3570_s8, %s3569_s14  }
  0x7b   : > { %s793_s9 = scalar_lea.vmem [#allocation23], %s3083_s24  ;;  %s837_s5 = scalar_lea.vmem [#allocation26], %s3080_s17 }
  0x7c   : > { %s798_s3 = scalar_lea.hbm %s3579_s0, %s3086_s21  ;;  %s801_s28 = sshll.u32 %s793_s9, 4  ;;  %s802_s28 = int_to_ptr.vmem [resolvable:$true] %s801_s28 }
  0x7d   : > { %s799_s2 = sshll.u32 %s798_s3, 4  ;;  %s844_s30 = sshll.u32 %s837_s5, 4  ;;  %s800_s2 = int_to_ptr.hbm [resolvable:$true] %s799_s2  ;;  %s845_s30 = int_to_ptr.vmem [resolvable:$true] %s844_s30 }
  0x7e   : > { %2141 = dma.hbm_to_vmem [thread:$0]  (%p3050_p12), %s800_s2, 512, %s802_s28, %s3580_s22, %s3570_s8, %s3570_s8, %s3569_s14  }
  0x7f   : > { %s840_s4 = scalar_lea.hbm %s3581_s26, %s2839_s18  ;;  %s3582_s24 = scalar_lea.sflag [#allocation25], %s3077_s16 }
  0x80   : > { %s842_s20 = sshll.u32 %s840_s4, 4  ;;  %s843_s20 = int_to_ptr.hbm [resolvable:$true] %s842_s20 }
  0x81   : > { %2143 = dma.hbm_to_vmem [thread:$0]  (%p3050_p12), %s843_s20, 16, %s845_s30, %s3582_s24  }
  0x82 PF: > { %p1980_p1 = scmp.ge.s32.totalorder %s2847_s1, 1  ;;  %p849_p3 = scmp.lt.s32.totalorder %s2847_s1, 13 }
  0x84   : > { %p850_p6 = pnand %p1980_p1, %p849_p3 }
  0x85   : > { %s3583_s21 = sld [smem:[#allocation40_spill]] (!%p850_p6) }
  0x86   : > { %853 = sbr.rel (%p850_p6) target bundleno = 1819 (0x71b), region = 88 }
  0x8b   : > { %s3249_s8 = sand.u32 1, %s3583_s21  }
  0x8c   : > { %s3528_s4 = sshll.u32 %s3249_s8, 3  ;;  %s856_s17 = scalar_lea.sflag [#allocation4], %s3249_s8 }
  0x8d   : > { %s3255_s11 = scalar_lea.vmem [#allocation3], %s3528_s4 }
  0x8e   : > { %2770 = dma.done.wait (%p3032_p7), %s856_s17, 128  }
  0x8f   : > { %2772 = vsyncadd (%p3032_p7), %s856_s17, 4294967168  ;;  %s3585_s16 = sld [smem:[#allocation43_spill]] }
  0x90   : > { %s3586_s27 = sld [smem:[#allocation37_spill]] }
  0x95   : > { %s3262_s0 = sand.u32 1, %s3585_s16  }
  0x96   : > { %s3265_s3 = sand.u32 1, %s3586_s27   ;;  %s866_s28 = scalar_lea.sflag [#allocation7], %s3262_s0 }
  0x97   : > { %s3268_s9 = sshll.u32 %s3265_s3, 5 }
  0x98   : > { %s3272_s2 = scalar_lea.vmem [#allocation6], %s3268_s9 }
  0x99   : > { %2774 = dma.done.wait (%p3056_p13), %s866_s28, 1024  }
  0x9a   : > { %2776 = vsyncadd (%p3056_p13), %s866_s28, 4294966272  ;;  %s3279_s22 = scalar_lea.vmem [#allocation8], %s3268_s9  ;;  %s886_s25 = scalar_lea.sflag [#allocation10], %s3262_s0 }
  0x9b   : > { %s3283_s13 = scalar_lea.vmem [#allocation9], %s3268_s9 }
  0x9c   : > { %2778 = dma.done.wait (%p3056_p13), %s886_s25, 528  }
  0x9d   : > { %2780 = vsyncadd (%p3056_p13), %s886_s25, 4294966768  ;;  %s905_s5 = scalar_lea.sflag [#allocation13], %s3262_s0 }
  0x9e   : > { %2782 = dma.done.wait (%p3056_p13), %s905_s5, 32  }
  0x9f   : > { %2784 = vsyncadd (%p3056_p13), %s905_s5, 4294967264  ;;  %s923_s24 = scalar_lea.sflag [#allocation16], %s3262_s0  ;;  %s3299_s21 = scalar_lea.vmem [#allocation15], %s3268_s9 }
  0xa0   : > { %2786 = dma.done.wait (%p3056_p13), %s923_s24, 528  }
  0xa1   : > { %2788 = vsyncadd (%p3056_p13), %s923_s24, 4294966768  ;;  %s942_s17 = scalar_lea.sflag [#allocation19], %s3262_s0 }
  0xa2   : > { %2790 = dma.done.wait (%p3056_p13), %s942_s17, 528  }
  0xa3   : > { %2792 = vsyncadd (%p3056_p13), %s942_s17, 4294966768  ;;  %s3313_s27 = scalar_lea.vmem [#allocation20], %s3268_s9  ;;  %s961_s28 = scalar_lea.sflag [#allocation22], %s3262_s0 }
  0xa4   : > { %2794 = dma.done.wait (%p3056_p13), %s961_s28, 528  }
  0xa5   : > { %2796 = vsyncadd (%p3056_p13), %s961_s28, 4294966768  ;;  %s3322_s5 = scalar_lea.vmem [#allocation23], %s3268_s9  ;;  %s980_s24 = scalar_lea.sflag [#allocation25], %s3262_s0 }
  0xa6   : > { %2798 = dma.done.wait (%p3056_p13), %s980_s24, 32  }
  0xa7   : > { %2800 = vsyncadd (%p3056_p13), %s980_s24, 4294967264  ;;  %s3588_s16 = sld [smem:[#allocation41_spill]]  ;;  %s991_s4 = scalar_lea.vmem [#allocation26], %s3265_s3 }
  0xa8   : > { %s3589_s20 = sld [smem:[#allocation58_spill]]  ;;  %s3591_s23 = sshll.u32 %s3249_s8, 3 }
  0xa9   : > { %s3590_s26 = sld [smem:[#allocation62_spill]]  ;;  %s3345_s24 = scalar_lea.vmem [#allocation27], %s3591_s23 }
  0xad   : > { %p1111_p7 = scmp.lt.s32.totalorder %s3588_s16, 5  ;;  %p1989_p9 = scmp.ne.s32.totalorder %s3588_s16, 0 }
  0xaf   : > { %s3332_s25 = scalar_select %p1111_p7, %s3588_s16, 5 }
  0xb0   : > { %1121 = sbr.rel (%p1989_p9) target bundleno = 183 (0xb7), region = 152 }
  0xb1   : > { %s1113_s9 = scalar_lea.vmem %s3589_s20, %s3332_s25  ;;  %s1116_s30 = scalar_lea.vmem %s3590_s26, %s3332_s25 }
  0xb5   : > { %v1122_v0 = vld [vmem:[%s3255_s11] sm:$0xff]  ;;  %vm1123_vm0 = vcmask 523264  }
  0xb6   : > { %1124 = vst.msk [vmem:[#allocation2] sm:$0xff] %vm1123_vm0, %v1122_v0 }
  0xb7 PF: > { %v2108_v1 = vld [vmem:[%s3272_s2 + $0x18] sm:$0xff]  ;;  %v2107_v3 = vld [vmem:[%s3272_s2 + $0x10] sm:$0xff]  ;;  %v2106_v5 = vld [vmem:[%s3272_s2 + $0x8] sm:$0xff]  ;;  %vm1163_vm1 = vcmask 523264   ;;  %s3592_s11 = scalar_lea.vmem [#allocation12], %s3265_s3  ;;  %vm1300_vm2 = vcmask 64512  }
  0xb8   : > { %v2112_v2 = vld [vmem:[%s3279_s22 + $0x18] sm:$0xff]  ;;  %1171 = vmatpush.bf16.msra.mxu0 %v2108_v1  ;;  %v2111_v4 = vld [vmem:[%s3279_s22 + $0x10] sm:$0xff]  ;;  %v2110_v6 = vld [vmem:[%s3279_s22 + $0x8] sm:$0xff]  ;;  %vm1316_vm3 = vcmask 1043456   ;;  %v2851_v57 = vmov 64.0   ;;  %s3597_s14 = scalar_lea.vmem [#allocation18], %s3265_s3 }
  0xb9   : > { %1221 = vmatpush.bf16.msra.mxu1 %v2112_v2  ;;  %v2105_v7 = vld [vmem:[%s3272_s2] sm:$0xff]  ;;  %v2258_v11 = vld [vmem:[%s3592_s11] ss:$0 sm:$0xff]  ;;  %s3593_s2 = scalar_lea.vmem [#allocation11], %s3265_s3  ;;  %v2116_v22 = vld [vmem:[%s3283_s13 + $0x18] sm:$0xff]  ;;  %s3598_s16 = scalar_lea.vmem [#allocation21], %s3265_s3 }
  0xba   : > { %v2109_v8 = vld [vmem:[%s3279_s22] sm:$0xff]  ;;  %v2257_v14 = vld [vmem:[%s3593_s2] ss:$0 sm:$0xff]  ;;  %1271 = vmatpush.bf16.msra.mxu2 %v2116_v22  ;;  %v2115_v23 = vld [vmem:[%s3283_s13 + $0x10] sm:$0xff]  ;;  %s3594_s22 = scalar_lea.vmem [#allocation14], %s3265_s3  ;;  %s3601_s25 = sld [smem:[#allocation41_spill]] }
  0xbb   : > { %v2114_v24 = vld [vmem:[%s3283_s13 + $0x8] sm:$0xff]  ;;  %v2113_v25 = vld [vmem:[%s3283_s13] sm:$0xff]  ;;  %v2119_v41 = vld [vmem:[%s3299_s21 + $0x10] sm:$0xff] }
  0xbc   : > { %1172 = vmatpush.bf16.msra.mxu0 %v2107_v3  ;;  %v2259_v32 = vld [vmem:[%s3594_s22] ss:$0 sm:$0xff]  ;;  %v2120_v40 = vld [vmem:[%s3299_s21 + $0x18] sm:$0xff]  ;;  %v2118_v42 = vld [vmem:[%s3299_s21 + $0x8] sm:$0xff] }
  0xbd   : > { %1222 = vmatpush.bf16.msra.mxu1 %v2111_v4  ;;  %v3357_v9 = vld [vmem:[#allocation2] sm:$0xff] }
  0xbe   : > { %v1126_v10 = vpack.c.bf16 %v3357_v9, %v3357_v9  ;;  %1272 = vmatpush.bf16.msra.mxu2 %v2115_v23  ;;  %v2117_v43 = vld [vmem:[%s3299_s21] sm:$0xff]  ;;  %s3596_s21 = scalar_lea.vmem [#allocation17], %s3265_s3 }
  0xbf   : > { %v2260_v51 = vld [vmem:[%s1113_s9] ss:$0 sm:$0xff] }
  0xc0   : > { %1173 = vmatpush.bf16.msra.mxu0 %v2106_v5  ;;  %v2124_v5 = vld [vmem:[%s3313_s27 + $0x18] sm:$0xff]  ;;  %p2094_p11 = scmp.ne.s32.totalorder %s3601_s25, 5 }
  0xc1   : > { %1223 = vmatpush.bf16.msra.mxu1 %v2110_v6  ;;  %v2123_v6 = vld [vmem:[%s3313_s27 + $0x10] sm:$0xff] }
  0xc2   : > { %1273 = vmatpush.bf16.msra.mxu2 %v2114_v24  ;;  %v2262_v24 = vld [vmem:[%s3597_s14] ss:$0 sm:$0xff] }
  0xc4   : > { %1174 = vmatpush.bf16.msra.mxu0 %v2105_v7  ;;  %v2122_v7 = vld [vmem:[%s3313_s27 + $0x8] sm:$0xff] }
  0xc5   : > { %1224 = vmatpush.bf16.msra.mxu1 %v2109_v8  ;;  %v2121_v8 = vld [vmem:[%s3313_s27] sm:$0xff] }
  0xc6   : > { %1274 = vmatpush.bf16.msra.mxu2 %v2113_v25 }
  0xc7   : > { %2006 = vmatmul.msk.bf16.vlgmr.msra.gmra.mxu0 %vm1163_vm1, %v1126_v10 }
  0xc8   : > { %2023 = vmatmul.msk.bf16.vlgmr.msra.gmra.mxu1 %vm1163_vm1, %v1126_v10  ;;  %1377 = vmatpush.bf16.msrb.mxu0 %v2120_v40 }
  0xc9   : > { %2040 = vmatmul.msk.bf16.vlgmr.msra.gmra.mxu2 %vm1163_vm1, %v1126_v10  ;;  %1470 = vmatpush.bf16.msrb.mxu1 %v2124_v5 }
  0xcc   : > { %1378 = vmatpush.bf16.msrb.mxu0 %v2119_v41 }
  0xcd   : > { %1471 = vmatpush.bf16.msrb.mxu1 %v2123_v6 }
  0xd0   : > { %1379 = vmatpush.bf16.msrb.mxu0 %v2118_v42 }
  0xd1   : > { %1472 = vmatpush.bf16.msrb.mxu1 %v2122_v7 }
  0xd4   : > { %1380 = vmatpush.bf16.msrb.mxu0 %v2117_v43 }
  0xd5   : > { %1473 = vmatpush.bf16.msrb.mxu1 %v2121_v8 }
 0x144   : > { %v1176_v12 = vpop.f32.mrf.mxu0 }
 0x145   : > { %v1226_v13 = vpop.f32.mrf.mxu1  ;;  %v1177_v17 = vadd.f32 %v2257_v14, %v1176_v12  ;;  %v2127_v12 = vld [vmem:[%s3322_s5 + $0x10] sm:$0xff]  ;;  %v2126_v14 = vld [vmem:[%s3322_s5 + $0x8] sm:$0xff] }
 0x146   : > { %v1227_v15 = vadd.f32 %v2258_v11, %v1226_v13 }
 0x147   : > { %v1180_v21 = vpack.c.bf16 %v1177_v17, %v1177_v17 }
 0x148   : > { %v1230_v16 = vpack.c.bf16 %v1227_v15, %v1227_v15 }
 0x14a   : > { %v1285_v18 = vsel %vm1163_vm1, %v1230_v16, 0 }
 0x14b   : > { %1294 = vmatpush.bf16.xpose.msra.mxu3 %v1285_v18 }
 0x14c   : > { %v1178_v19 = vpop.f32.mrf.mxu0  ;;  %v1276_v33 = vpop.f32.mrf.mxu2 }
 0x14d   : > { %v1228_v20 = vpop.f32.mrf.mxu1  ;;  %v1277_v34 = vadd.f32 %v2259_v32, %v1276_v33 }
 0x14f   : > { %v1280_v35 = vpack.c.bf16 %v1277_v34, %v1277_v34 }
 0x151   : > { %v1318_v38 = vsel %vm1316_vm3, %v1280_v35, 0  ;;  %v2264_v35 = vld [vmem:[%s1116_s30] ss:$0 sm:$0xff]  ;;  %s3600_s30 = scalar_lea.vmem [#allocation24], %s3265_s3 }
 0x152   : > { %2041 = vmatmul.msk.bf16.vlgmr.msra.gmra.mxu3 %vm1163_vm1, %v1180_v21  ;;  %v2261_v21 = vld [vmem:[%s3596_s21] ss:$0 sm:$0xff] }
 0x153   : > { %1327 = vmatpush.bf16.msrb.mxu3 %v1318_v38 }
 0x154   : > { %v1278_v39 = vpop.f32.mrf.mxu2 }
 0x1d5   : > { %v1296_v26 = vpop.f32.mrf.mxu3 }
 0x1d6   : > { %v1301_v27 = vsel %vm1300_vm2, %v1296_v26, -inf }
 0x1d7   : > { %1302 = vmax.xlane.f32.xlu0 %v1301_v27 }
 0x1dd   : > { %v1298_v28 = vpop.f32.mrf.mxu3 }
 0x1de   : > { %v2125_v28 = vld [vmem:[%s3322_s5] sm:$0xff] }
 0x24a   : > { %v1303_v29 = vpop.xlane.xlu0 %1302 }
 0x24b   : > { %v1304_v30 = vsub.f32 %v1296_v26, %v1303_v29  ;;  %v2263_v29 = vld [vmem:[%s3598_s16] ss:$0 sm:$0xff] }
 0x24d   : > { %v1305_v31 = vmul.f32 1.442695, %v1304_v30 }
 0x24f   : > { %2267 = vpow2.f32 %v1305_v31 }
 0x255   : > { %v2268_v36 = vpop.eup %2267 }
 0x256   : > { %v1307_v37 = vsel %vm1300_vm2, %v2268_v36, 0.0 }
 0x257   : > { %1308 = vadd.xlane.f32.xlu0 %v1307_v37 }
 0x2ca   : > { %v1309_v44 = vpop.xlane.xlu0 %1308 }
 0x2cb   : > { %2269 = vrcp.f32 %v1309_v44 }
 0x2cc   : > { %2271 = vrcp.f32 %v2851_v57  ;;  %v2266_v57 = vld [vmem:[%s991_s4] ss:$0 sm:$0xff] }
 0x2d1   : > { %v2270_v45 = vpop.eup %2269 }
 0x2d2   : > { %v1311_v46 = vmul.f32 %v2270_v45, %v2268_v36  ;;  %v2272_v58 = vpop.eup %2271 }
 0x2d3   : > { %v1393_v59 = vmul.f32 64.0, %v2272_v58  ;;  %vm1397_vm4 = vweird.f32 %v2272_v58 }
 0x2d4   : > { %v1312_v47 = vpack.c.bf16 %v1311_v46, %v1311_v46 }
 0x2d5   : > { %v1394_v60 = vsub.f32 1.0, %v1393_v59 }
 0x2d6   : > { %2042 = vmatmul.msk.bf16.vlgmr.msrb.gmra.mxu3 %vm1300_vm2, %v1312_v47 }
 0x2d7   : > { %v1395_v61 = vmul.f32 %v2272_v58, %v1394_v60 }
 0x2d9   : > { %v1396_v62 = vadd.f32 %v2272_v58, %v1395_v61 }
 0x2db   : > { %v3391_v63 = vsel %vm1397_vm4, %v2272_v58, %v1396_v62 }
 0x359   : > { %v1329_v48 = vpop.f32.mrf.mxu3 }
 0x35a   : > { %v1333_v49 = vpack.c.bf16 %v1329_v48, %v1329_v48 }
 0x35c   : > { %2059 = vmatmul.msk.bf16.vlgmr.msrb.gmra.mxu0 %vm1163_vm1, %v1333_v49 }
 0x361   : > { %v1331_v50 = vpop.f32.mrf.mxu3 }
 0x3d9   : > { %v1382_v52 = vpop.f32.mrf.mxu0 }
 0x3da   : > { %v1383_v53 = vadd.f32 %v2260_v51, %v1382_v52 }
 0x3dc   : > { %v1386_v54 = vadd.f32 %v1383_v53, %v3357_v9  ;;  %v2128_v9 = vld [vmem:[%s3322_s5 + $0x18] sm:$0xff] }
 0x3dd   : > { %1524 = vmatpush.bf16.msrb.mxu2 %v2128_v9 }
 0x3de   : > { %v1389_v55 = vsel %vm1163_vm1, %v1386_v54, 0.0 }
 0x3df   : > { %1390 = vadd.xlane.f32.xlu1 %v1389_v55  ;;  %v2265_v55 = vld [vmem:[%s3600_s30] ss:$0 sm:$0xff] }
 0x3e1   : > { %v1384_v56 = vpop.f32.mrf.mxu0  ;;  %1525 = vmatpush.bf16.msrb.mxu2 %v2127_v12 }
 0x3e5   : > { %1526 = vmatpush.bf16.msrb.mxu2 %v2126_v14 }
 0x3e9   : > { %1527 = vmatpush.bf16.msrb.mxu2 %v2125_v28 }
 0x452   : > { %v1391_v0 = vpop.xlane.xlu1 %1390 }
 0x453   : > { %v1399_v1 = vmul.f32 %v3391_v63, %v1391_v0 }
 0x455   : > { %v1400_v2 = vsub.f32 %v1386_v54, %v1399_v1 }
 0x457   : > { %v1401_v3 = vmul.f32 %v1400_v2, %v1400_v2 }
 0x459   : > { %v1402_v4 = vsel %vm1163_vm1, %v1401_v3, 0.0 }
 0x45a   : > { %1403 = vadd.xlane.f32.xlu1 %v1402_v4 }
 0x4cd   : > { %v1404_v10 = vpop.xlane.xlu1 %1403 }
 0x4ce   : > { %v1405_v11 = vmul.f32 %v1404_v10, %v3391_v63 }
 0x4d0   : > { %v1406_v13 = vadd.f32 1e-05, %v1405_v11 }
 0x4d2   : > { %2273 = vrsqrt.f32 %v1406_v13  ;;  %vm1413_vm6 = vweird.f32 %v1406_v13 }
 0x4d8   : > { %v2274_v15 = vpop.eup %2273 }
 0x4d9   : > { %v1408_v16 = vmul.f32 %v2274_v15, %v1406_v13  ;;  %vm1414_vm5 = vweird.f32 %v2274_v15 }
 0x4da   : > { %vm1415_vm7 = vmor %vm1413_vm6, %vm1414_vm5 }
 0x4db   : > { %v1409_v17 = vmul.f32 %v2274_v15, %v1408_v16 }
 0x4dd   : > { %v1410_v18 = vmul.f32 0.5, %v1409_v17 }
 0x4df   : > { %v1411_v19 = vsub.f32 1.5, %v1410_v18 }
 0x4e1   : > { %v1412_v20 = vmul.f32 %v2274_v15, %v1411_v19 }
 0x4e3   : > { %v1416_v22 = vsel %vm1415_vm7, %v2274_v15, %v1412_v20 }
 0x4e4   : > { %v1417_v23 = vmul.f32 %v1416_v22, %v1400_v2 }
 0x4e6   : > { %v1421_v25 = vmul.f32 %v2261_v21, %v1417_v23 }
 0x4e8   : > { %v1425_v26 = vadd.f32 %v2262_v24, %v1421_v25 }
 0x4ea   : > { %v1426_v27 = vpack.c.bf16 %v1425_v26, %v1425_v26 }
 0x4ec   : > { %2076 = vmatmul.msk.bf16.vlgmr.msrb.gmra.mxu1 %vm1163_vm1, %v1426_v27 }
 0x569   : > { %v1475_v30 = vpop.f32.mrf.mxu1 }
 0x56a   : > { %v1476_v31 = vadd.f32 %v2263_v29, %v1475_v30 }
 0x56c   : > { %v1479_v32 = vmax.f32 %v1476_v31, 0.0 }
 0x56e   : > { %v1480_v33 = vpack.c.bf16 %v1479_v32, %v1479_v32 }
 0x570   : > { %2093 = vmatmul.msk.bf16.vlgmr.msrb.gmra.mxu2 %vm1163_vm1, %v1480_v33 }
 0x571   : > { %v1477_v34 = vpop.f32.mrf.mxu1 }
 0x5f3   : > { %v1529_v36 = vpop.f32.mrf.mxu2 }
 0x5f4   : > { %v1530_v37 = vadd.f32 %v2264_v35, %v1529_v36 }
 0x5f6   : > { %v1533_v38 = vadd.f32 %v1530_v37, %v1425_v26 }
 0x5f8   : > { %v1536_v39 = vsel %vm1163_vm1, %v1533_v38, 0.0 }
 0x5f9   : > { %1537 = vadd.xlane.f32.xlu2 %v1536_v39 }
 0x5fb   : > { %v1531_v40 = vpop.f32.mrf.mxu2 }
 0x66c   : > { %v1538_v41 = vpop.xlane.xlu2 %1537 }
 0x66d   : > { %v1539_v42 = vmul.f32 %v1538_v41, %v3391_v63 }
 0x66f   : > { %v1540_v43 = vsub.f32 %v1533_v38, %v1539_v42 }
 0x671   : > { %v1541_v44 = vmul.f32 %v1540_v43, %v1540_v43 }
 0x673   : > { %v1542_v45 = vsel %vm1163_vm1, %v1541_v44, 0.0 }
 0x674   : > { %1543 = vadd.xlane.f32.xlu2 %v1542_v45 }
 0x6e7   : > { %v1544_v46 = vpop.xlane.xlu2 %1543 }
 0x6e8   : > { %v1545_v47 = vmul.f32 %v1544_v46, %v3391_v63 }
 0x6ea   : > { %v1546_v48 = vadd.f32 1e-05, %v1545_v47 }
 0x6ec   : > { %2275 = vrsqrt.f32 %v1546_v48  ;;  %vm1553_vm9 = vweird.f32 %v1546_v48 }
 0x6f2   : > { %v2276_v49 = vpop.eup %2275 }
 0x6f3   : > { %v1548_v50 = vmul.f32 %v2276_v49, %v1546_v48  ;;  %vm1554_vm8 = vweird.f32 %v2276_v49 }
 0x6f4   : > { %vm1555_vm10 = vmor %vm1553_vm9, %vm1554_vm8 }
 0x6f5   : > { %v1549_v51 = vmul.f32 %v2276_v49, %v1548_v50 }
 0x6f7   : > { %v1550_v52 = vmul.f32 0.5, %v1549_v51 }
 0x6f9   : > { %v1551_v53 = vsub.f32 1.5, %v1550_v52 }
 0x6fb   : > { %v1552_v54 = vmul.f32 %v2276_v49, %v1551_v53 }
 0x6fd   : > { %v1556_v56 = vsel %vm1555_vm10, %v2276_v49, %v1552_v54 }
 0x6fe   : > { %v1557_v58 = vmul.f32 %v1556_v56, %v1540_v43 }
 0x700   : > { %v1561_v59 = vmul.f32 %v2265_v55, %v1557_v58  ;;  %1570 = sbr.rel (%p2094_p11) target bundleno = 1798 (0x706), region = 156 }
 0x702   : > { %v1565_v60 = vadd.f32 %v2266_v57, %v1561_v59 }
 0x704   : > { %1566 = vst.msk [vmem:[#allocation2] sm:$0xff] %vm1163_vm1, %v1565_v60 }
 0x705   : > { %1571 = vst.msk [vmem:[%s3345_s24] sm:$0xff] %vm1163_vm1, %v1565_v60 }
 0x706 PF: > { %s3602_s5 = sld [smem:[#allocation42_spill]]  ;;  %s1585_s2 = sshll.u32 %s3345_s24, 4  ;;  %s1586_s2 = int_to_ptr.vmem [resolvable:$true] %s1585_s2 }
 0x707   : > { %s3604_s4 = sld [smem:[#allocation64_spill]]  ;;  %s1573_s13 = scalar_lea.sflag [#allocation5], %s3249_s8 }
 0x70c   : > { %s2096_s0 = sshll.u32 %s3602_s5, 3 }
 0x70d   : > { %s1583_s11 = scalar_lea.hbm %s3604_s4, %s2096_s0  ;;  %s2717_s16 = scalar_lea.hbm %s3604_s4, 16 }
 0x70e   : > { %s1587_s22 = sshll.u32 %s1583_s11, 4  ;;  %s1588_s22 = int_to_ptr.hbm [resolvable:$true] %s1587_s22 }
 0x70f   : > { %s2711_s26 = sshra.s32 %s1588_s22, 4  ;;  %s2712_s26 = int_to_ptr.hbm [resolvable:$true] %s2711_s26 }
 0x710   : > { %s2713_s20 = scalar_lea.hbm %s2712_s26, 8  ;;  %p2718_p5 = scmp.lt.s32.totalorder %s2712_s26, %s3604_s4 }
 0x711   : > { %p2714_p12 = scmp.ne.s32.totalorder %s2712_s26, %s2713_s20  ;;  %p2719_p8 = scmp.lt.s32.totalorder %s2717_s16, %s2713_s20 }
 0x713   : > { %p2715_p13 = pnand %p2714_p12, %p3064_p4  ;;  %p2720_p2 = por %p2719_p8, %p2718_p5 }
 0x715   : > { %p2716_p0 = pneg %p2715_p13 }
 0x717   : > { %p2721_p1 = pnand %p2720_p2, %p2716_p0 }
 0x719   : > { %2724 = shalt.err (!%p2721_p1)
}
 0x71a   : > { %2159 = dma.vmem_to_hbm [thread:$0]  (%p3064_p4), %s1586_s2, 128, %s1588_s22, %s1573_s13  }
 0x71b PF: > { %s3605_s8 = sld [smem:[#allocation39_spill]]  ;;  %p2165_p3 = scmp.ge.s32.totalorder %s2847_s1, 2 }
 0x71d   : > { %p2162_p6 = pnand %p2165_p3, %p3071_p10 }
 0x71f   : > { %p2163_p7 = pneg %p2162_p6 }
 0x721   : > { %s1599_s28 = sand.u32 1, %s3605_s8  }
 0x722   : > { %s1600_s30 = scalar_lea.sflag [#allocation5], %s1599_s28 }
 0x723   : > { %2802 = dma.done.wait (%p2163_p7), %s1600_s30, 128  }
 0x724   : > { %2804 = vsyncadd (%p2163_p7), %s1600_s30, 4294967168  ;;  %s54_s1 = sadd.s32 1, %s2847_s1   ;;  %s3607_s24 = sld [smem:[#allocation37_spill]] }
 0x725   : > { %p51_p9 = scmp.ge.s32.totalorder %s54_s1, 14   ;;  %s3608_s25 = sld [smem:[#allocation38_spill]] }
 0x726   : > { %s3609_s26 = sld [smem:[#allocation47_spill]]  ;;  %s3614_s28 = smov %s2827_s29 }
 0x727   : > { %s3610_s27 = sld [smem:[#allocation40_spill]]  ;;  %s3616_s0 = smov %s2839_s18 }
 0x728   : > { %s3611_s5 = sld [smem:[#allocation48_spill]]  ;;  %s3617_s30 = smov %s2843_s19 }
 0x729   : > { %s3612_s9 = sld [smem:[#allocation44_spill]] }
 0x72a   : > { %s3613_s23 = sld [smem:[#allocation45_spill]] }
 0x72c   :  { %53 = sbr.rel (!%p51_p9) target bundleno = 37 (0x25), region = 315 }
 0x72e   : > { %s3615_s29 = smov %s3611_s5 }
 0x72f   : > { %s3618_s18 = smov %s3612_s9 }
 0x730   : > { %s3619_s19 = smov %s3613_s23 }
 0x731   :  { %1606 = vsyncpa [#allocation4], 1 }
 0x732   :  { %1608 = vsyncpa [#allocation4 + $0x1], 1 }
 0x733   :  { %1609 = vsyncpa [#allocation7], 1 }
 0x734   :  { %1611 = vsyncpa [#allocation7 + $0x1], 1 }
 0x735   :  { %1612 = vsyncpa [#allocation10], 1 }
 0x736   :  { %1614 = vsyncpa [#allocation10 + $0x1], 1 }
 0x737   :  { %1615 = vsyncpa [#allocation13], 1 }
 0x738   :  { %1617 = vsyncpa [#allocation13 + $0x1], 1 }
 0x739   :  { %1618 = vsyncpa [#allocation16], 1 }
 0x73a   :  { %1620 = vsyncpa [#allocation16 + $0x1], 1 }
 0x73b   :  { %1621 = vsyncpa [#allocation19], 1 }
 0x73c   :  { %1623 = vsyncpa [#allocation19 + $0x1], 1 }
 0x73d   :  { %1624 = vsyncpa [#allocation22], 1 }
 0x73e   :  { %1626 = vsyncpa [#allocation22 + $0x1], 1 }
 0x73f   :  { %1627 = vsyncpa [#allocation25], 1 }
 0x740   :  { %1629 = vsyncpa [#allocation25 + $0x1], 1 }
 0x741   :  { %1630 = vsyncpa [#allocation5], 1 }
 0x742   :  { %1632 = vsyncpa [#allocation5 + $0x1], 1 }

</bundles_post_ra>
